<compile_context>
chip_gen: v5e
topology: v5e:2x2
jax: 0.10.0
libtpu: 0.0.40
codegen_flags: <defaults>
</compile_context>

<pallas_src>
import functools
import numpy as np
import jax
import jax.numpy as jnp
from jax import lax
from jax.experimental import pallas as pl
from jax.experimental.pallas import tpu as pltpu


def _norm(x, alpha, beta, eps=1e-6):
    # torch Norm: alpha * (x - mean) / (std_unbiased + eps) + bias
    d = x.shape[-1]
    mean = jnp.mean(x, axis=-1, keepdims=True)
    centered = x - mean
    var = jnp.sum(centered * centered, axis=-1, keepdims=True) * (1.0 / (d - 1))
    std = jnp.sqrt(var)
    # Exact divide (review correctness concern): only 2 rows of divides/layer.
    return alpha * centered / (std + eps) + beta


def encoder_layer_kernel(x_ref,
                         wqkv_ref, bqkv_ref,
                         wo_ref, bo_ref,
                         w1_ref, b1_ref,
                         w2_ref, b2_ref,
                         alpha_ref, beta_ref,
                         out_ref,
                         *, n_head):
    x = x_ref[0]                              # (S, D) f32
    S, D = x.shape
    dh = D // n_head

    alpha = alpha_ref[...]                    # (1, D) f32 — read once (hoisted)
    beta = beta_ref[...]                      # (1, D) f32

    # ---- fused QKV projection: one MXU matmul with N = 3D ----
    # 1/sqrt(dh) is already folded into the q columns of wqkv and into bq.
    qkv_f32 = jnp.dot(x.astype(jnp.bfloat16), wqkv_ref[...],
                      preferred_element_type=jnp.float32) + bqkv_ref[...]
    qkv = qkv_f32.astype(jnp.bfloat16)        # single bf16 copy live across heads

    # Lane-dense (S, D) f32 accumulator: per-head out-projection fused here.
    acc = jnp.zeros((S, D), jnp.float32)

    # TODO(synk): switch to lax.fori_loop / a heads grid axis with
    # 128-lane-aligned dh at realistic shapes; at dh=8 dynamic lane slicing
    # would force relayouts, so the 4-iteration static loop is kept.
    for h in range(n_head):
        lo = h * dh
        qh = qkv[:, lo:lo + dh]                             # (S, dh) bf16
        kh = qkv[:, D + lo:D + lo + dh]                     # (S, dh) bf16
        vh = qkv[:, 2 * D + lo:2 * D + lo + dh]             # (S, dh) bf16
        # contract on the shared dh axis — no materialized transpose
        scores = lax.dot_general(
            qh, kh, dimension_numbers=(((1,), (1,)), ((), ())),
            preferred_element_type=jnp.float32)             # (S, S) f32
        scores = scores - jnp.max(scores, axis=-1, keepdims=True)
        p = jnp.exp(scores)                                 # un-normalized
        inv_den = pl.reciprocal(jnp.sum(p, axis=-1, keepdims=True), approx=True)
        head = jnp.dot(p.astype(jnp.bfloat16), vh,
                       preferred_element_type=jnp.float32)  # (S, dh) f32
        head = (head * inv_den).astype(jnp.bfloat16)        # post-PV normalize
        # Fused output projection: accumulate into lane-dense (S, D).
        acc = acc + jnp.dot(head, wo_ref[lo:lo + dh, :],
                            preferred_element_type=jnp.float32)

    attn = acc + bo_ref[...]

    # ---- residual + Norm ----
    sub1 = x + attn
    ln1 = _norm(sub1, alpha, beta)

    # ---- feed-forward ----
    ff = jnp.dot(ln1.astype(jnp.bfloat16), w1_ref[...],
                 preferred_element_type=jnp.float32) + b1_ref[...]
    ff = jnp.maximum(ff, 0.0)
    ff = jnp.dot(ff.astype(jnp.bfloat16), w2_ref[...],
                 preferred_element_type=jnp.float32) + b2_ref[...]

    # ---- residual + Norm ----
    # TODO(synk): emit bf16 output here if the next layer accepts it.
    out_ref[0] = _norm(ff + ln1, alpha, beta)


def prepare_params(params, n_head):
    """One-time weight prep (hoisted out of the per-call wrapper).

    Fuses Q/K/V weights into a single (D, 3D) bf16 matrix, folds the 1/sqrt(dh)
    attention scale into the q columns (and bq), and casts matmul weights to
    bf16.  Biases / alpha / beta stay f32.
    """
    D = params["wq"].shape[0]
    dh = D // n_head
    scale = 1.0 / np.sqrt(dh)
    wqkv = jnp.concatenate([params["wq"] * scale, params["wk"], params["wv"]],
                           axis=1).astype(jnp.bfloat16)          # (D, 3D)
    bqkv = jnp.concatenate([params["bq"] * scale, params["bk"], params["bv"]],
                           axis=1).astype(jnp.float32)           # (1, 3D)
    return {
        "wqkv": wqkv, "bqkv": bqkv,
        "wo": params["wo"].astype(jnp.bfloat16),
        "bo": params["bo"].astype(jnp.float32),
        "w1": params["w1"].astype(jnp.bfloat16),
        "b1": params["b1"].astype(jnp.float32),
        "w2": params["w2"].astype(jnp.bfloat16),
        "b2": params["b2"].astype(jnp.float32),
        "alpha": params["alpha"].astype(jnp.float32),
        "beta": params["beta"].astype(jnp.float32),
    }


def encoder_layer(x, prepared, n_head):
    B, S, D = x.shape

    weight_args = [
        prepared["wqkv"], prepared["bqkv"],
        prepared["wo"], prepared["bo"],
        prepared["w1"], prepared["b1"],
        prepared["w2"], prepared["b2"],
        prepared["alpha"], prepared["beta"],
    ]

    # Whole-array VMEM residency for weights: copied in once, NOT part of the
    # grid pipeline -> no hidden 2x double-buffering of weights.
    # TODO(synk): stream FFN weights (K-tiled emit_pipeline) once bf16 weights
    # approach the v7x 64 MiB budget at large D.
    vmem_spec = pl.BlockSpec(memory_space=pltpu.MemorySpace.VMEM)
    in_specs = ([pl.BlockSpec((1, S, D), lambda b: (b, 0, 0))]
                + [vmem_spec] * len(weight_args))

    kernel = functools.partial(encoder_layer_kernel, n_head=n_head)
    return pl.pallas_call(
        kernel,
        out_shape=jax.ShapeDtypeStruct((B, S, D), jnp.float32),
        grid_spec=pltpu.PrefetchScalarGridSpec(
            num_scalar_prefetch=0,
            # TODO(synk): add an S-tile grid axis (flash-style) at realistic S
            # so each v7x TensorCore runs several pipelined grid steps.
            grid=(B,),
            in_specs=in_specs,
            out_specs=pl.BlockSpec((1, S, D), lambda b: (b, 0, 0)),
        ),
        compiler_params=pltpu.CompilerParams(
            dimension_semantics=("parallel",)),
    )(x, *weight_args)


def encoder_layer_ref(x, params, n_head):
    """Pure-JAX f32 reference with the module's semantics (for validation)."""
    B, S, D = x.shape
    dh = D // n_head

    def norm(t):
        mean = jnp.mean(t, axis=-1, keepdims=True)
        c = t - mean
        std = jnp.sqrt(jnp.sum(c * c, axis=-1, keepdims=True) / (D - 1))
        return params["alpha"] * c / (std + 1e-6) + params["beta"]

    q = x @ params["wq"] + params["bq"]
    k = x @ params["wk"] + params["bk"]
    v = x @ params["wv"] + params["bv"]
    q = q.reshape(B, S, n_head, dh).transpose(0, 2, 1, 3)
    k = k.reshape(B, S, n_head, dh).transpose(0, 2, 1, 3)
    v = v.reshape(B, S, n_head, dh).transpose(0, 2, 1, 3)
    scores = jnp.einsum("bhqd,bhkd->bhqk", q, k) / np.sqrt(dh)
    p = jax.nn.softmax(scores, axis=-1)
    attn = jnp.einsum("bhqk,bhkd->bhqd", p, v).transpose(0, 2, 1, 3).reshape(B, S, D)
    attn = attn @ params["wo"] + params["bo"]
    ln1 = norm(x + attn)
    ff = jnp.maximum(ln1 @ params["w1"] + params["b1"], 0.0)
    ff = ff @ params["w2"] + params["b2"]
    return norm(ff + ln1)


def make_params(key, d_model, n_hidden):
    ks = jax.random.split(key, 8)
    s = 0.1
    return {
        "wq": s * jax.random.normal(ks[0], (d_model, d_model), jnp.float32),
        "wk": s * jax.random.normal(ks[1], (d_model, d_model), jnp.float32),
        "wv": s * jax.random.normal(ks[2], (d_model, d_model), jnp.float32),
        "wo": s * jax.random.normal(ks[3], (d_model, d_model), jnp.float32),
        "w1": s * jax.random.normal(ks[4], (d_model, n_hidden), jnp.float32),
        "w2": s * jax.random.normal(ks[5], (n_hidden, d_model), jnp.float32),
        "bq": s * jax.random.normal(ks[6], (1, d_model), jnp.float32),
        "bk": jnp.zeros((1, d_model), jnp.float32),
        "bv": jnp.zeros((1, d_model), jnp.float32),
        "bo": s * jax.random.normal(ks[7], (1, d_model), jnp.float32),
        "b1": jnp.zeros((1, n_hidden), jnp.float32),
        "b2": jnp.zeros((1, d_model), jnp.float32),
        "alpha": jnp.ones((1, d_model), jnp.float32),   # Norm.alpha init = ones
        "beta": jnp.zeros((1, d_model), jnp.float32),   # Norm.bias  init = zeros
    }


if __name__ == "__main__":
    B, S, D, H, NH = 2, 8, 32, 64, 4
    key = jax.random.PRNGKey(0)
    kx, kp = jax.random.split(key)
    x = jax.random.normal(kx, (B, S, D), jnp.float32)
    params = make_params(kp, D, H)

    # Weight prep done ONCE at parameter-build time (hoisted out of the call).
    prepared = prepare_params(params, NH)

    out = encoder_layer(x, prepared, NH)
    out = jax.block_until_ready(out)

    ref = encoder_layer_ref(x, params, NH)
    # Tolerance accounts for bf16 matmul inputs + approx softmax reciprocal.
    np.testing.assert_allclose(np.asarray(out), np.asarray(ref),
                               rtol=2e-2, atol=2e-2)
    print("KERNEL_OK")
</pallas_src>

<mosaic_0001>
module attributes {stable_mosaic.version = 11 : i64} {
  func.func @encoder_layer_kernel(%arg0: i32, %arg1: memref<1x8x32xf32, #tpu.memory_space<vmem>>, %arg2: memref<32x96xbf16, #tpu.memory_space<vmem>>, %arg3: memref<1x96xf32, #tpu.memory_space<vmem>>, %arg4: memref<32x32xbf16, #tpu.memory_space<vmem>>, %arg5: memref<1x32xf32, #tpu.memory_space<vmem>>, %arg6: memref<32x64xbf16, #tpu.memory_space<vmem>>, %arg7: memref<1x64xf32, #tpu.memory_space<vmem>>, %arg8: memref<64x32xbf16, #tpu.memory_space<vmem>>, %arg9: memref<1x32xf32, #tpu.memory_space<vmem>>, %arg10: memref<1x32xf32, #tpu.memory_space<vmem>>, %arg11: memref<1x32xf32, #tpu.memory_space<vmem>>, %arg12: memref<1x8x32xf32, #tpu.memory_space<vmem>>) attributes {dimension_semantics = [#tpu.dimension_semantics<parallel>], iteration_bounds = array<i64: 2>, scalar_prefetch = 0 : i64, scratch_operands = 0 : i64, tpu.core_type = #tpu.core_type<tc>, window_params = [{transform_indices = @transform_0, window_bounds = array<i64: 1, 8, 32>}, {pipeline_mode = #tpu.pipeline_mode<synchronous>, transform_indices = @transform_1, window_bounds = array<i64: 32, 96>}, {pipeline_mode = #tpu.pipeline_mode<synchronous>, transform_indices = @transform_2, window_bounds = array<i64: 1, 96>}, {pipeline_mode = #tpu.pipeline_mode<synchronous>, transform_indices = @transform_3, window_bounds = array<i64: 32, 32>}, {pipeline_mode = #tpu.pipeline_mode<synchronous>, transform_indices = @transform_4, window_bounds = array<i64: 1, 32>}, {pipeline_mode = #tpu.pipeline_mode<synchronous>, transform_indices = @transform_5, window_bounds = array<i64: 32, 64>}, {pipeline_mode = #tpu.pipeline_mode<synchronous>, transform_indices = @transform_6, window_bounds = array<i64: 1, 64>}, {pipeline_mode = #tpu.pipeline_mode<synchronous>, transform_indices = @transform_7, window_bounds = array<i64: 64, 32>}, {pipeline_mode = #tpu.pipeline_mode<synchronous>, transform_indices = @transform_8, window_bounds = array<i64: 1, 32>}, {pipeline_mode = #tpu.pipeline_mode<synchronous>, transform_indices = @transform_9, window_bounds = array<i64: 1, 32>}, {pipeline_mode = #tpu.pipeline_mode<synchronous>, transform_indices = @transform_10, window_bounds = array<i64: 1, 32>}, {transform_indices = @transform_11, window_bounds = array<i64: 1, 8, 32>}]} {
    %c0 = arith.constant 0 : index
    %c0_0 = arith.constant 0 : index
    %c0_1 = arith.constant 0 : index
    %0 = vector.load %arg1[%c0, %c0_0, %c0_1] : memref<1x8x32xf32, #tpu.memory_space<vmem>>, vector<1x8x32xf32>
    %1 = vector.shape_cast %0 : vector<1x8x32xf32> to vector<8x32xf32>
    %c0_2 = arith.constant 0 : index
    %c0_3 = arith.constant 0 : index
    %2 = vector.load %arg10[%c0_2, %c0_3] : memref<1x32xf32, #tpu.memory_space<vmem>>, vector<1x32xf32>
    %c0_4 = arith.constant 0 : index
    %c0_5 = arith.constant 0 : index
    %3 = vector.load %arg11[%c0_4, %c0_5] : memref<1x32xf32, #tpu.memory_space<vmem>>, vector<1x32xf32>
    %4 = arith.truncf %1 : vector<8x32xf32> to vector<8x32xbf16>
    %c0_6 = arith.constant 0 : index
    %c0_7 = arith.constant 0 : index
    %5 = vector.load %arg2[%c0_6, %c0_7] : memref<32x96xbf16, #tpu.memory_space<vmem>>, vector<32x96xbf16>
    %cst = arith.constant dense<0.000000e+00> : vector<8x96xf32>
    %6 = tpu.matmul %4, %5, %cst {dimension_numbers = #tpu.dot_dimension_numbers<[1], [0], [0], [1], [0, 0, 1, 1], [], []>} : vector<8x32xbf16>, vector<32x96xbf16>, vector<8x96xf32> -> vector<8x96xf32>
    %c0_8 = arith.constant 0 : index
    %c0_9 = arith.constant 0 : index
    %7 = vector.load %arg3[%c0_8, %c0_9] : memref<1x96xf32, #tpu.memory_space<vmem>>, vector<1x96xf32>
    %8 = vector.broadcast %7 : vector<1x96xf32> to vector<8x96xf32>
    %9 = arith.addf %6, %8 : vector<8x96xf32>
    %10 = arith.truncf %9 : vector<8x96xf32> to vector<8x96xbf16>
    %cst_10 = arith.constant 0.000000e+00 : f32
    %11 = vector.broadcast %cst_10 : f32 to vector<8x32xf32>
    %12 = vector.extract_strided_slice %10 {offsets = [0, 0], sizes = [8, 8], strides = [1, 1]} : vector<8x96xbf16> to vector<8x8xbf16>
    %13 = vector.extract_strided_slice %10 {offsets = [0, 32], sizes = [8, 8], strides = [1, 1]} : vector<8x96xbf16> to vector<8x8xbf16>
    %14 = vector.extract_strided_slice %10 {offsets = [0, 64], sizes = [8, 8], strides = [1, 1]} : vector<8x96xbf16> to vector<8x8xbf16>
    %cst_11 = arith.constant dense<0.000000e+00> : vector<8x8xf32>
    %15 = tpu.matmul %12, %13, %cst_11 {dimension_numbers = #tpu.dot_dimension_numbers<[1], [1], [0], [0], [0, 0, 1, 0], [], []>} : vector<8x8xbf16>, vector<8x8xbf16>, vector<8x8xf32> -> vector<8x8xf32>
    %cst_12 = arith.constant dense<0xFF800000> : vector<8xf32>
    %16 = vector.multi_reduction <maximumf>, %15, %cst_12 [1] : vector<8x8xf32> to vector<8xf32>
    %17 = vector.shape_cast %16 : vector<8xf32> to vector<8x1xf32>
    %18 = vector.broadcast %17 : vector<8x1xf32> to vector<8x8xf32>
    %19 = arith.subf %15, %18 : vector<8x8xf32>
    %20 = math.exp %19 : vector<8x8xf32>
    %cst_13 = arith.constant dense<0.000000e+00> : vector<8xf32>
    %21 = vector.multi_reduction <add>, %20, %cst_13 [1] : vector<8x8xf32> to vector<8xf32>
    %22 = vector.shape_cast %21 : vector<8xf32> to vector<8x1xf32>
    %23 = tpu.reciprocal %22 {approx = true} : vector<8x1xf32> -> vector<8x1xf32>
    %24 = arith.truncf %20 : vector<8x8xf32> to vector<8x8xbf16>
    %cst_14 = arith.constant dense<0.000000e+00> : vector<8x8xf32>
    %25 = tpu.matmul %24, %14, %cst_14 {dimension_numbers = #tpu.dot_dimension_numbers<[1], [0], [0], [1], [0, 0, 1, 1], [], []>} : vector<8x8xbf16>, vector<8x8xbf16>, vector<8x8xf32> -> vector<8x8xf32>
    %26 = vector.broadcast %23 : vector<8x1xf32> to vector<8x8xf32>
    %27 = arith.mulf %25, %26 : vector<8x8xf32>
    %28 = arith.truncf %27 : vector<8x8xf32> to vector<8x8xbf16>
    %c0_15 = arith.constant 0 : index
    %c0_16 = arith.constant 0 : index
    %29 = vector.load %arg4[%c0_15, %c0_16] : memref<32x32xbf16, #tpu.memory_space<vmem>>, vector<8x32xbf16>
    %cst_17 = arith.constant dense<0.000000e+00> : vector<8x32xf32>
    %30 = tpu.matmul %28, %29, %cst_17 {dimension_numbers = #tpu.dot_dimension_numbers<[1], [0], [0], [1], [0, 0, 1, 1], [], []>} : vector<8x8xbf16>, vector<8x32xbf16>, vector<8x32xf32> -> vector<8x32xf32>
    %31 = arith.addf %11, %30 : vector<8x32xf32>
    %32 = vector.extract_strided_slice %10 {offsets = [0, 8], sizes = [8, 8], strides = [1, 1]} : vector<8x96xbf16> to vector<8x8xbf16>
    %33 = vector.extract_strided_slice %10 {offsets = [0, 40], sizes = [8, 8], strides = [1, 1]} : vector<8x96xbf16> to vector<8x8xbf16>
    %34 = vector.extract_strided_slice %10 {offsets = [0, 72], sizes = [8, 8], strides = [1, 1]} : vector<8x96xbf16> to vector<8x8xbf16>
    %cst_18 = arith.constant dense<0.000000e+00> : vector<8x8xf32>
    %35 = tpu.matmul %32, %33, %cst_18 {dimension_numbers = #tpu.dot_dimension_numbers<[1], [1], [0], [0], [0, 0, 1, 0], [], []>} : vector<8x8xbf16>, vector<8x8xbf16>, vector<8x8xf32> -> vector<8x8xf32>
    %cst_19 = arith.constant dense<0xFF800000> : vector<8xf32>
    %36 = vector.multi_reduction <maximumf>, %35, %cst_19 [1] : vector<8x8xf32> to vector<8xf32>
    %37 = vector.shape_cast %36 : vector<8xf32> to vector<8x1xf32>
    %38 = vector.broadcast %37 : vector<8x1xf32> to vector<8x8xf32>
    %39 = arith.subf %35, %38 : vector<8x8xf32>
    %40 = math.exp %39 : vector<8x8xf32>
    %cst_20 = arith.constant dense<0.000000e+00> : vector<8xf32>
    %41 = vector.multi_reduction <add>, %40, %cst_20 [1] : vector<8x8xf32> to vector<8xf32>
    %42 = vector.shape_cast %41 : vector<8xf32> to vector<8x1xf32>
    %43 = tpu.reciprocal %42 {approx = true} : vector<8x1xf32> -> vector<8x1xf32>
    %44 = arith.truncf %40 : vector<8x8xf32> to vector<8x8xbf16>
    %cst_21 = arith.constant dense<0.000000e+00> : vector<8x8xf32>
    %45 = tpu.matmul %44, %34, %cst_21 {dimension_numbers = #tpu.dot_dimension_numbers<[1], [0], [0], [1], [0, 0, 1, 1], [], []>} : vector<8x8xbf16>, vector<8x8xbf16>, vector<8x8xf32> -> vector<8x8xf32>
    %46 = vector.broadcast %43 : vector<8x1xf32> to vector<8x8xf32>
    %47 = arith.mulf %45, %46 : vector<8x8xf32>
    %48 = arith.truncf %47 : vector<8x8xf32> to vector<8x8xbf16>
    %c8 = arith.constant 8 : index
    %c0_22 = arith.constant 0 : index
    %49 = vector.load %arg4[%c8, %c0_22] : memref<32x32xbf16, #tpu.memory_space<vmem>>, vector<8x32xbf16>
    %cst_23 = arith.constant dense<0.000000e+00> : vector<8x32xf32>
    %50 = tpu.matmul %48, %49, %cst_23 {dimension_numbers = #tpu.dot_dimension_numbers<[1], [0], [0], [1], [0, 0, 1, 1], [], []>} : vector<8x8xbf16>, vector<8x32xbf16>, vector<8x32xf32> -> vector<8x32xf32>
    %51 = arith.addf %31, %50 : vector<8x32xf32>
    %52 = vector.extract_strided_slice %10 {offsets = [0, 16], sizes = [8, 8], strides = [1, 1]} : vector<8x96xbf16> to vector<8x8xbf16>
    %53 = vector.extract_strided_slice %10 {offsets = [0, 48], sizes = [8, 8], strides = [1, 1]} : vector<8x96xbf16> to vector<8x8xbf16>
    %54 = vector.extract_strided_slice %10 {offsets = [0, 80], sizes = [8, 8], strides = [1, 1]} : vector<8x96xbf16> to vector<8x8xbf16>
    %cst_24 = arith.constant dense<0.000000e+00> : vector<8x8xf32>
    %55 = tpu.matmul %52, %53, %cst_24 {dimension_numbers = #tpu.dot_dimension_numbers<[1], [1], [0], [0], [0, 0, 1, 0], [], []>} : vector<8x8xbf16>, vector<8x8xbf16>, vector<8x8xf32> -> vector<8x8xf32>
    %cst_25 = arith.constant dense<0xFF800000> : vector<8xf32>
    %56 = vector.multi_reduction <maximumf>, %55, %cst_25 [1] : vector<8x8xf32> to vector<8xf32>
    %57 = vector.shape_cast %56 : vector<8xf32> to vector<8x1xf32>
    %58 = vector.broadcast %57 : vector<8x1xf32> to vector<8x8xf32>
    %59 = arith.subf %55, %58 : vector<8x8xf32>
    %60 = math.exp %59 : vector<8x8xf32>
    %cst_26 = arith.constant dense<0.000000e+00> : vector<8xf32>
    %61 = vector.multi_reduction <add>, %60, %cst_26 [1] : vector<8x8xf32> to vector<8xf32>
    %62 = vector.shape_cast %61 : vector<8xf32> to vector<8x1xf32>
    %63 = tpu.reciprocal %62 {approx = true} : vector<8x1xf32> -> vector<8x1xf32>
    %64 = arith.truncf %60 : vector<8x8xf32> to vector<8x8xbf16>
    %cst_27 = arith.constant dense<0.000000e+00> : vector<8x8xf32>
    %65 = tpu.matmul %64, %54, %cst_27 {dimension_numbers = #tpu.dot_dimension_numbers<[1], [0], [0], [1], [0, 0, 1, 1], [], []>} : vector<8x8xbf16>, vector<8x8xbf16>, vector<8x8xf32> -> vector<8x8xf32>
    %66 = vector.broadcast %63 : vector<8x1xf32> to vector<8x8xf32>
    %67 = arith.mulf %65, %66 : vector<8x8xf32>
    %68 = arith.truncf %67 : vector<8x8xf32> to vector<8x8xbf16>
    %c16 = arith.constant 16 : index
    %c0_28 = arith.constant 0 : index
    %69 = vector.load %arg4[%c16, %c0_28] : memref<32x32xbf16, #tpu.memory_space<vmem>>, vector<8x32xbf16>
    %cst_29 = arith.constant dense<0.000000e+00> : vector<8x32xf32>
    %70 = tpu.matmul %68, %69, %cst_29 {dimension_numbers = #tpu.dot_dimension_numbers<[1], [0], [0], [1], [0, 0, 1, 1], [], []>} : vector<8x8xbf16>, vector<8x32xbf16>, vector<8x32xf32> -> vector<8x32xf32>
    %71 = arith.addf %51, %70 : vector<8x32xf32>
    %72 = vector.extract_strided_slice %10 {offsets = [0, 24], sizes = [8, 8], strides = [1, 1]} : vector<8x96xbf16> to vector<8x8xbf16>
    %73 = vector.extract_strided_slice %10 {offsets = [0, 56], sizes = [8, 8], strides = [1, 1]} : vector<8x96xbf16> to vector<8x8xbf16>
    %74 = vector.extract_strided_slice %10 {offsets = [0, 88], sizes = [8, 8], strides = [1, 1]} : vector<8x96xbf16> to vector<8x8xbf16>
    %cst_30 = arith.constant dense<0.000000e+00> : vector<8x8xf32>
    %75 = tpu.matmul %72, %73, %cst_30 {dimension_numbers = #tpu.dot_dimension_numbers<[1], [1], [0], [0], [0, 0, 1, 0], [], []>} : vector<8x8xbf16>, vector<8x8xbf16>, vector<8x8xf32> -> vector<8x8xf32>
    %cst_31 = arith.constant dense<0xFF800000> : vector<8xf32>
    %76 = vector.multi_reduction <maximumf>, %75, %cst_31 [1] : vector<8x8xf32> to vector<8xf32>
    %77 = vector.shape_cast %76 : vector<8xf32> to vector<8x1xf32>
    %78 = vector.broadcast %77 : vector<8x1xf32> to vector<8x8xf32>
    %79 = arith.subf %75, %78 : vector<8x8xf32>
    %80 = math.exp %79 : vector<8x8xf32>
    %cst_32 = arith.constant dense<0.000000e+00> : vector<8xf32>
    %81 = vector.multi_reduction <add>, %80, %cst_32 [1] : vector<8x8xf32> to vector<8xf32>
    %82 = vector.shape_cast %81 : vector<8xf32> to vector<8x1xf32>
    %83 = tpu.reciprocal %82 {approx = true} : vector<8x1xf32> -> vector<8x1xf32>
    %84 = arith.truncf %80 : vector<8x8xf32> to vector<8x8xbf16>
    %cst_33 = arith.constant dense<0.000000e+00> : vector<8x8xf32>
    %85 = tpu.matmul %84, %74, %cst_33 {dimension_numbers = #tpu.dot_dimension_numbers<[1], [0], [0], [1], [0, 0, 1, 1], [], []>} : vector<8x8xbf16>, vector<8x8xbf16>, vector<8x8xf32> -> vector<8x8xf32>
    %86 = vector.broadcast %83 : vector<8x1xf32> to vector<8x8xf32>
    %87 = arith.mulf %85, %86 : vector<8x8xf32>
    %88 = arith.truncf %87 : vector<8x8xf32> to vector<8x8xbf16>
    %c24 = arith.constant 24 : index
    %c0_34 = arith.constant 0 : index
    %89 = vector.load %arg4[%c24, %c0_34] : memref<32x32xbf16, #tpu.memory_space<vmem>>, vector<8x32xbf16>
    %cst_35 = arith.constant dense<0.000000e+00> : vector<8x32xf32>
    %90 = tpu.matmul %88, %89, %cst_35 {dimension_numbers = #tpu.dot_dimension_numbers<[1], [0], [0], [1], [0, 0, 1, 1], [], []>} : vector<8x8xbf16>, vector<8x32xbf16>, vector<8x32xf32> -> vector<8x32xf32>
    %91 = arith.addf %71, %90 : vector<8x32xf32>
    %c0_36 = arith.constant 0 : index
    %c0_37 = arith.constant 0 : index
    %92 = vector.load %arg5[%c0_36, %c0_37] : memref<1x32xf32, #tpu.memory_space<vmem>>, vector<1x32xf32>
    %93 = vector.broadcast %92 : vector<1x32xf32> to vector<8x32xf32>
    %94 = arith.addf %91, %93 : vector<8x32xf32>
    %95 = arith.addf %1, %94 : vector<8x32xf32>
    %cst_38 = arith.constant dense<0.000000e+00> : vector<8xf32>
    %96 = vector.multi_reduction <add>, %95, %cst_38 [1] : vector<8x32xf32> to vector<8xf32>
    %97 = vector.shape_cast %96 : vector<8xf32> to vector<8x1xf32>
    %cst_39 = arith.constant 3.200000e+01 : f32
    %98 = vector.broadcast %cst_39 : f32 to vector<8x1xf32>
    %99 = arith.divf %97, %98 : vector<8x1xf32>
    %100 = vector.broadcast %99 : vector<8x1xf32> to vector<8x32xf32>
    %101 = arith.subf %95, %100 : vector<8x32xf32>
    %102 = arith.mulf %101, %101 : vector<8x32xf32>
    %cst_40 = arith.constant dense<0.000000e+00> : vector<8xf32>
    %103 = vector.multi_reduction <add>, %102, %cst_40 [1] : vector<8x32xf32> to vector<8xf32>
    %104 = vector.shape_cast %103 : vector<8xf32> to vector<8x1xf32>
    %cst_41 = arith.constant 0.0322580636 : f32
    %105 = vector.broadcast %cst_41 : f32 to vector<8x1xf32>
    %106 = arith.mulf %104, %105 : vector<8x1xf32>
    %107 = math.sqrt %106 : vector<8x1xf32>
    %108 = vector.broadcast %2 : vector<1x32xf32> to vector<8x32xf32>
    %109 = arith.mulf %108, %101 : vector<8x32xf32>
    %cst_42 = arith.constant 9.99999997E-7 : f32
    %110 = vector.broadcast %cst_42 : f32 to vector<8x1xf32>
    %111 = arith.addf %107, %110 : vector<8x1xf32>
    %112 = vector.broadcast %111 : vector<8x1xf32> to vector<8x32xf32>
    %113 = arith.divf %109, %112 : vector<8x32xf32>
    %114 = vector.broadcast %3 : vector<1x32xf32> to vector<8x32xf32>
    %115 = arith.addf %113, %114 : vector<8x32xf32>
    %116 = arith.truncf %115 : vector<8x32xf32> to vector<8x32xbf16>
    %c0_43 = arith.constant 0 : index
    %c0_44 = arith.constant 0 : index
    %117 = vector.load %arg6[%c0_43, %c0_44] : memref<32x64xbf16, #tpu.memory_space<vmem>>, vector<32x64xbf16>
    %cst_45 = arith.constant dense<0.000000e+00> : vector<8x64xf32>
    %118 = tpu.matmul %116, %117, %cst_45 {dimension_numbers = #tpu.dot_dimension_numbers<[1], [0], [0], [1], [0, 0, 1, 1], [], []>} : vector<8x32xbf16>, vector<32x64xbf16>, vector<8x64xf32> -> vector<8x64xf32>
    %c0_46 = arith.constant 0 : index
    %c0_47 = arith.constant 0 : index
    %119 = vector.load %arg7[%c0_46, %c0_47] : memref<1x64xf32, #tpu.memory_space<vmem>>, vector<1x64xf32>
    %120 = vector.broadcast %119 : vector<1x64xf32> to vector<8x64xf32>
    %121 = arith.addf %118, %120 : vector<8x64xf32>
    %cst_48 = arith.constant 0.000000e+00 : f32
    %122 = vector.broadcast %cst_48 : f32 to vector<8x64xf32>
    %123 = arith.maximumf %121, %122 : vector<8x64xf32>
    %124 = arith.truncf %123 : vector<8x64xf32> to vector<8x64xbf16>
    %c0_49 = arith.constant 0 : index
    %c0_50 = arith.constant 0 : index
    %125 = vector.load %arg8[%c0_49, %c0_50] : memref<64x32xbf16, #tpu.memory_space<vmem>>, vector<64x32xbf16>
    %cst_51 = arith.constant dense<0.000000e+00> : vector<8x32xf32>
    %126 = tpu.matmul %124, %125, %cst_51 {dimension_numbers = #tpu.dot_dimension_numbers<[1], [0], [0], [1], [0, 0, 1, 1], [], []>} : vector<8x64xbf16>, vector<64x32xbf16>, vector<8x32xf32> -> vector<8x32xf32>
    %c0_52 = arith.constant 0 : index
    %c0_53 = arith.constant 0 : index
    %127 = vector.load %arg9[%c0_52, %c0_53] : memref<1x32xf32, #tpu.memory_space<vmem>>, vector<1x32xf32>
    %128 = vector.broadcast %127 : vector<1x32xf32> to vector<8x32xf32>
    %129 = arith.addf %126, %128 : vector<8x32xf32>
    %130 = arith.addf %129, %115 : vector<8x32xf32>
    %cst_54 = arith.constant dense<0.000000e+00> : vector<8xf32>
    %131 = vector.multi_reduction <add>, %130, %cst_54 [1] : vector<8x32xf32> to vector<8xf32>
    %132 = vector.shape_cast %131 : vector<8xf32> to vector<8x1xf32>
    %cst_55 = arith.constant 3.200000e+01 : f32
    %133 = vector.broadcast %cst_55 : f32 to vector<8x1xf32>
    %134 = arith.divf %132, %133 : vector<8x1xf32>
    %135 = vector.broadcast %134 : vector<8x1xf32> to vector<8x32xf32>
    %136 = arith.subf %130, %135 : vector<8x32xf32>
    %137 = arith.mulf %136, %136 : vector<8x32xf32>
    %cst_56 = arith.constant dense<0.000000e+00> : vector<8xf32>
    %138 = vector.multi_reduction <add>, %137, %cst_56 [1] : vector<8x32xf32> to vector<8xf32>
    %139 = vector.shape_cast %138 : vector<8xf32> to vector<8x1xf32>
    %cst_57 = arith.constant 0.0322580636 : f32
    %140 = vector.broadcast %cst_57 : f32 to vector<8x1xf32>
    %141 = arith.mulf %139, %140 : vector<8x1xf32>
    %142 = math.sqrt %141 : vector<8x1xf32>
    %143 = vector.broadcast %2 : vector<1x32xf32> to vector<8x32xf32>
    %144 = arith.mulf %143, %136 : vector<8x32xf32>
    %cst_58 = arith.constant 9.99999997E-7 : f32
    %145 = vector.broadcast %cst_58 : f32 to vector<8x1xf32>
    %146 = arith.addf %142, %145 : vector<8x1xf32>
    %147 = vector.broadcast %146 : vector<8x1xf32> to vector<8x32xf32>
    %148 = arith.divf %144, %147 : vector<8x32xf32>
    %149 = vector.broadcast %3 : vector<1x32xf32> to vector<8x32xf32>
    %150 = arith.addf %148, %149 : vector<8x32xf32>
    %c0_59 = arith.constant 0 : index
    %c0_60 = arith.constant 0 : index
    %c0_61 = arith.constant 0 : index
    %151 = vector.load %arg12[%c0_59, %c0_60, %c0_61] : memref<1x8x32xf32, #tpu.memory_space<vmem>>, vector<1x8x32xf32>
    %152 = vector.shape_cast %151 : vector<1x8x32xf32> to vector<8x32xf32>
    %153 = vector.shape_cast %150 : vector<8x32xf32> to vector<1x8x32xf32>
    tpu.vector_store %arg12[%c0_59, %c0_60, %c0_61], %153 {strides = array<i32>} : memref<1x8x32xf32, #tpu.memory_space<vmem>>, vector<1x8x32xf32>,
    return
  }
  func.func @transform_0(%arg0: i32) -> (i32, i32, i32) {
    %c0_i32 = arith.constant 0 : i32
    %c0_i32_0 = arith.constant 0 : i32
    %c0_i32_1 = arith.constant 0 : i32
    return %arg0, %c0_i32, %c0_i32_0 : i32, i32, i32
  }
  func.func @transform_1(%arg0: i32) -> (i32, i32) {
    %c0_i32 = arith.constant 0 : i32
    %c0_i32_0 = arith.constant 0 : i32
    %c0_i32_1 = arith.constant 0 : i32
    return %c0_i32, %c0_i32_0 : i32, i32
  }
  func.func @transform_2(%arg0: i32) -> (i32, i32) {
    %c0_i32 = arith.constant 0 : i32
    %c0_i32_0 = arith.constant 0 : i32
    %c0_i32_1 = arith.constant 0 : i32
    return %c0_i32, %c0_i32_0 : i32, i32
  }
  func.func @transform_3(%arg0: i32) -> (i32, i32) {
    %c0_i32 = arith.constant 0 : i32
    %c0_i32_0 = arith.constant 0 : i32
    %c0_i32_1 = arith.constant 0 : i32
    return %c0_i32, %c0_i32_0 : i32, i32
  }
  func.func @transform_4(%arg0: i32) -> (i32, i32) {
    %c0_i32 = arith.constant 0 : i32
    %c0_i32_0 = arith.constant 0 : i32
    %c0_i32_1 = arith.constant 0 : i32
    return %c0_i32, %c0_i32_0 : i32, i32
  }
  func.func @transform_5(%arg0: i32) -> (i32, i32) {
    %c0_i32 = arith.constant 0 : i32
    %c0_i32_0 = arith.constant 0 : i32
    %c0_i32_1 = arith.constant 0 : i32
    return %c0_i32, %c0_i32_0 : i32, i32
  }
  func.func @transform_6(%arg0: i32) -> (i32, i32) {
    %c0_i32 = arith.constant 0 : i32
    %c0_i32_0 = arith.constant 0 : i32
    %c0_i32_1 = arith.constant 0 : i32
    return %c0_i32, %c0_i32_0 : i32, i32
  }
  func.func @transform_7(%arg0: i32) -> (i32, i32) {
    %c0_i32 = arith.constant 0 : i32
    %c0_i32_0 = arith.constant 0 : i32
    %c0_i32_1 = arith.constant 0 : i32
    return %c0_i32, %c0_i32_0 : i32, i32
  }
  func.func @transform_8(%arg0: i32) -> (i32, i32) {
    %c0_i32 = arith.constant 0 : i32
    %c0_i32_0 = arith.constant 0 : i32
    %c0_i32_1 = arith.constant 0 : i32
    return %c0_i32, %c0_i32_0 : i32, i32
  }
  func.func @transform_9(%arg0: i32) -> (i32, i32) {
    %c0_i32 = arith.constant 0 : i32
    %c0_i32_0 = arith.constant 0 : i32
    %c0_i32_1 = arith.constant 0 : i32
    return %c0_i32, %c0_i32_0 : i32, i32
  }
  func.func @transform_10(%arg0: i32) -> (i32, i32) {
    %c0_i32 = arith.constant 0 : i32
    %c0_i32_0 = arith.constant 0 : i32
    %c0_i32_1 = arith.constant 0 : i32
    return %c0_i32, %c0_i32_0 : i32, i32
  }
  func.func @transform_11(%arg0: i32) -> (i32, i32, i32) {
    %c0_i32 = arith.constant 0 : i32
    %c0_i32_0 = arith.constant 0 : i32
    %c0_i32_1 = arith.constant 0 : i32
    return %arg0, %c0_i32, %c0_i32_0 : i32, i32, i32
  }
}

</mosaic_0001>

<bundles_post_ra>
// kernel: tpu_custom_call.1
= control target key start
LH: loop header
LB: loop body
LE: loop exit
PB: predicated region body
PF: predicated region fallthrough
CT: control target
= control target key end

     0   :  { %s1583_s0 = inlined_call_operand.vmem [shape: f32[2,8,32], index: 0, kind: input, shape index: {}]   ;;  %s1584_s1 = inlined_call_operand.vmem [shape: bf16[32,96], index: 1, kind: input, shape index: {}]   ;;  %s1585_s2 = inlined_call_operand.vmem [shape: f32[1,96], index: 2, kind: input, shape index: {}]   ;;  %s1586_s3 = inlined_call_operand.vmem [shape: bf16[32,32], index: 3, kind: input, shape index: {}]   ;;  %s1587_s4 = inlined_call_operand.vmem [shape: f32[1,32], index: 4, kind: input, shape index: {}]   ;;  %s1588_s5 = inlined_call_operand.hbm [shape: bf16[32,64], index: 5, kind: input, shape index: {}]   ;;  %s1589_s6 = inlined_call_operand.vmem [shape: f32[1,64], index: 6, kind: input, shape index: {}]   ;;  %s1590_s7 = inlined_call_operand.vmem [shape: bf16[64,32], index: 7, kind: input, shape index: {}]   ;;  %s1591_s8 = inlined_call_operand.vmem [shape: f32[1,32], index: 8, kind: input, shape index: {}]   ;;  %s1592_s9 = inlined_call_operand.vmem [shape: f32[1,32], index: 9, kind: input, shape index: {}]   ;;  %s1593_s10 = inlined_call_operand.vmem [shape: f32[1,32], index: 10, kind: input, shape index: {}]   ;;  %s1594_s11 = inlined_call_operand.hbm [shape: f32[2,8,32], index: 11, kind: output, shape index: {}]  }
   0x1   :  { %1595 = sst [smem:[#allocation8_spill]] %s1588_s5 }
   0x2   :  { %16 = vsyncpa [#allocation3], 0 }
   0x3   :  { %17 = vsyncpa [#allocation4], 0 }
   0x4   :  { %19 = vsyncpa [#allocation4 + $0x1], 0  ;;  %s1371_s17 = smov 0   ;;  %s1373_s18 = smov 0  }
   0x5   :  { %s1375_s19 = smov 0   ;;  %s1377_s20 = smov 0  }
   0x6 LB: > { %s1392_s21 = sadd.s32 4294967295, %s1294_s20   ;;  %s1035_s22 = sadd.s32 4294967294, %s1294_s20   ;;  %s1294_s20 = sphi %s1377_s20, %s1602_s20   ;;  %s1290_s19 = sphi %s1375_s19, %s1601_s19   ;;  %s1286_s18 = sphi %s1373_s18, %s1600_s18   ;;  %s1282_s17 = sphi %s1371_s17, %s1599_s17  }
   0x7   : > { %s1396_s23 = sadd.s32 1, %s1294_s20   ;;  %s268_s24 = sadd.s32 1, %s1290_s19 }
   0x8   : > { %s265_s25 = ssub.s32 %s1294_s20, %s1396_s23  ;;  %p278_p0 = scmp.ne.s32.totalorder %s1290_s19, %s1286_s18 }
   0x9   : > { %p266_p1 = scmp.eq.s32.totalorder %s265_s25, 0  ;;  %p279_p2 = scmp.eq.s32.totalorder %s1392_s21, 1 }
   0xa   : > { %p284_p3 = scmp.ne.s32.totalorder %s1286_s18, %s1282_s17  ;;  %p285_p4 = scmp.eq.s32.totalorder %s1035_s22, 1 }
   0xb   : > { %s1407_s26 = scalar_select %p266_p1, %s1290_s19, %s268_s24  }
   0xc   : > { %p1409_p5 = por %p279_p2, %p278_p0  ;;  %p1413_p6 = por %p285_p4, %p284_p3 }
   0xd   : > { %p1036_p7 = scmp.ge.s32.totalorder %s1294_s20, 1  ;;  %p292_p8 = scmp.lt.s32.totalorder %s1294_s20, 3 }
   0xe   : > { %p1116_p9 = scmp.eq.s32.totalorder %s1392_s21, 0  ;;  %s1598_s5 = sld [smem:[#allocation8_spill]] }
   0xf   : > { %p293_p10 = pnand %p1036_p7, %p292_p8  ;;  %s1296_s13 = smov [#allocation2]  }
  0x10   : > { %s317_s14 = sshll.u32 %s1296_s13, 4  ;;  %s1297_s15 = smov 64   ;;  %s318_s14 = int_to_ptr.vmem [resolvable:$true] %s317_s14 }
  0x11   : > { %p1108_p11 = pneg %p293_p10  ;;  %s1298_s16 = smov 4  }
  0x12   : > { %355 = sbr.rel (%p293_p10) target bundleno = 2083 (0x823), region = 64 }
  0x13   : > { %p1109_p12 = pnand %p1116_p9, %p1108_p11 }
  0x14   : > { %s315_s12 = sshll.u32 %s1598_s5, 4  ;;  %s316_s12 = int_to_ptr.hbm [resolvable:$true] %s315_s12 }
  0x15   : > { %1111 = dma.hbm_to_vmem [thread:$0]  (!%p1109_p12), %s316_s12, 256, %s318_s14, [#allocation3], %s1297_s15, %s1297_s15, %s1298_s16  }
  0x17   : > { %1273 = dma.done.wait (%p1116_p9), [#allocation3], 256  }
  0x18   : > { %1275 = vsyncadd (%p1116_p9), [#allocation3], 4294967040  ;;  %p395_p13 = scmp.lt.s32.totalorder %s1392_s21, 1  ;;  %v1095_v0 = vld [vmem:[%s1584_s1 + $0x8] sm:$0xff]  ;;  %v1094_v1 = vld [vmem:[%s1584_s1] sm:$0xff]  ;;  %vm424_vm0 = vcmask 261120  }
  0x19   : > { %434 = vmatpush.bf16.msra.mxu0 %v1095_v0  ;;  %v1166_v4 = vld [vmem:[%s1585_s2] ss:$0 sm:$0xff]  ;;  %s1299_s5 = smov 88   ;;  %s1302_s25 = smov 120   ;;  %vm447_vm1 = vcmask 64512   ;;  %vm483_vm2 = vcmask 1043456  }
  0x1a   : > { %s396_s22 = scalar_select %p395_p13, %s1392_s21, 1  ;;  %v502_v16 = vld [vmem:[%s1586_s3] sm:$0xf]  ;;  %v560_v52 = vld [vmem:[%s1586_s3 + $0x4] sm:$0xf]  ;;  %vm889_vm10 = vcmask 523264  }
  0x1b   : > { %s1303_s29 = smov 80   ;;  %s1305_s13 = smov 112   ;;  %v584_v21 = vsel %vm483_vm2, %v502_v16, 0  ;;  %v565_v53 = vsel %vm483_vm2, %v560_v52, 0 }
  0x1c   : > { %s1042_s24 = sshll.u32 %s396_s22, 3  ;;  %s1300_s22 = smov 64  }
  0x1d   : > { %s398_s30 = scalar_lea.vmem %s1583_s0, %s1042_s24  ;;  %435 = vmatpush.bf16.msra.mxu0 %v1094_v1  ;;  %s1301_s24 = smov 96  }
  0x1e   : > { %v1440_v2 = vld [vmem:[%s398_s30] sm:$0xff]  ;;  %s1304_s30 = smov 72   ;;  %s1306_s12 = smov 104  }
  0x1f   : > { %v403_v3 = vpack.c.bf16 %v1440_v2, %v1440_v2  ;;  %s1307_s16 = smov 56  }
  0x21   : > { %1051 = vmatmul.msk.bf16.vlgmr.msra.gmra.mxu0 %vm424_vm0, %v403_v3 }
  0x22   : > { %574 = vmatpush.bf16.msrb.mxu0 %v565_v53 }
  0x9e   : > { %v437_v5 = vpop.f32.mrf.mxu0 }
  0x9f   : > { %v438_v6 = vadd.f32 %v1166_v4, %v437_v5 }
  0xa1   : > { %v441_v7 = vpack.c.bf16 %v438_v6, %v438_v6 }
  0xa3   : > { %v443_v8 = vunpack.c.l.b16 %v441_v7 }
  0xa5   : > { %v1448_v9 = vpack.c.b16 %v443_v8, %v443_v8 }
  0xa6   : > { %v439_v10 = vpop.f32.mrf.mxu0 }
  0xa7   : > { %505 = vrot.lane.b32.xlu2 %v1448_v9, %s1299_s5  ;;  %478 = vrot.lane.b32.xlu1 %v1448_v9, %s1300_s22  ;;  %s1308_s5 = smov 48  }
  0xa8   : > { %445 = vrot.lane.b32.xlu0 %v1448_v9, %s1301_s24 }
  0xaf   : > { %503 = vrot.lane.b32.xlu2 %v1448_v9, %s1302_s25  ;;  %s1309_s25 = smov 40  }
  0xb7   : > { %601 = vrot.lane.b32.xlu2 %v1448_v9, %s1303_s29  ;;  %s392_s29 = sand.u32 1, %s1286_s18  }
  0xb8   : > { %s949_s22 = scalar_lea.sflag [#allocation4], %s392_s29 }
  0xbf   : > { %679 = vrot.lane.b32.xlu2 %v1448_v9, %s1304_s30  ;;  %s1041_s30 = sshll.u32 %s392_s29, 3 }
  0xc7   : > { %599 = vrot.lane.b32.xlu2 %v1448_v9, %s1305_s13  ;;  %s1091_s13 = sshll.u32 %s1392_s21, 3 }
  0xc8   : > { %s959_s15 = scalar_lea.hbm %s1594_s11, %s1091_s13 }
  0xc9   : > { %s963_s21 = sshll.u32 %s959_s15, 4  ;;  %s964_s21 = int_to_ptr.hbm [resolvable:$true] %s963_s21 }
  0xca   : > { %s1242_s24 = sshra.s32 %s964_s21, 4  ;;  %s1243_s24 = int_to_ptr.hbm [resolvable:$true] %s1242_s24 }
  0xcb   : > { %p1249_p3 = scmp.lt.s32.totalorder %s1243_s24, %s1594_s11 }
  0xcf   : > { %677 = vrot.lane.b32.xlu2 %v1448_v9, %s1306_s12 }
 0x101   : > { %v506_v11 = vpop.permute.xlu2 %505 }
 0x102   : > { %v511_v12 = vsel %vm447_vm1, %v506_v11, 0 }
 0x103   : > { %520 = vmatpush.bf16.xpose.msra.mxu3 %v511_v12 }
 0x109   : > { %v504_v13 = vpop.permute.xlu2 %503 }
 0x10a   : > { %1054 = vmatmul.msk.bf16.vlgmr.msra.gmra.mxu3 %vm447_vm1, %v504_v13 }
 0x111   : > { %v602_v14 = vpop.permute.xlu2 %601 }
 0x112   : > { %v607_v15 = vsel %vm447_vm1, %v602_v14, 0 }
 0x113   : > { %616 = vmatpush.bf16.xpose.msrb.mxu3 %v607_v15 }
 0x119   : > { %v680_v17 = vpop.permute.xlu2 %679  ;;  %v479_v18 = vpop.permute.xlu1 %478 }
 0x11a   : > { %v446_v19 = vpop.permute.xlu0 %445  ;;  %v485_v20 = vsel %vm483_vm2, %v479_v18, 0  ;;  %v685_v24 = vsel %vm447_vm1, %v680_v17, 0 }
 0x11b   : > { %v452_v22 = vsel %vm447_vm1, %v446_v19, 0  ;;  %494 = vmatpush.bf16.msra.mxu2 %v485_v20 }
 0x11c   : > { %461 = vmatpush.bf16.xpose.msra.mxu1 %v452_v22 }
 0x121   : > { %v600_v23 = vpop.permute.xlu2 %599 }
 0x122   : > { %1058 = vmatmul.msk.bf16.vlgmr.msrb.gmra.mxu3 %vm447_vm1, %v600_v23 }
 0x123   : > { %1052 = vmatmul.msk.bf16.vlgmr.msra.gmra.mxu1 %vm447_vm1, %v441_v7 }
 0x124   : > { %593 = vmatpush.bf16.msrb.mxu1 %v584_v21 }
 0x128   : > { %694 = vmatpush.bf16.xpose.msra.mxu1 %v685_v24 }
 0x129   : > { %v678_v33 = vpop.permute.xlu2 %677 }
 0x18d   : > { %v522_v25 = vpop.f32.mrf.mxu3 }
 0x18e   : > { %v526_v26 = vsel %vm447_vm1, %v522_v25, -inf }
 0x18f   : > { %527 = vmax.xlane.f32.xlu2 %v526_v26 }
 0x195   : > { %v524_v27 = vpop.f32.mrf.mxu3 }
 0x1a0   : > { %v463_v28 = vpop.f32.mrf.mxu1 }
 0x1a1   : > { %v467_v29 = vsel %vm447_vm1, %v463_v28, -inf }
 0x1a2   : > { %468 = vmax.xlane.f32.xlu0 %v467_v29 }
 0x1a5   : > { %v618_v30 = vpop.f32.mrf.mxu3 }
 0x1a6   : > { %v622_v46 = vsel %vm447_vm1, %v618_v30, -inf }
 0x1a8   : > { %v465_v31 = vpop.f32.mrf.mxu1 }
 0x1ad   : > { %v620_v32 = vpop.f32.mrf.mxu3 }
 0x1ae   : > { %v734_v32 = vld [vmem:[%s1586_s3 + $0xc] sm:$0xf] }
 0x1b6   : > { %537 = vrot.lane.b32.xlu0 %v1448_v9, %s1307_s16  ;;  %s394_s16 = scalar_lea.vmem [#allocation5], %s1041_s30  ;;  %s1248_s30 = scalar_lea.hbm %s1594_s11, 16 }
 0x1be   : > { %633 = vrot.lane.b32.xlu0 %v1448_v9, %s1308_s5  ;;  %s961_s5 = sshll.u32 %s394_s16, 4  ;;  %s962_s5 = int_to_ptr.vmem [resolvable:$true] %s961_s5 }
 0x202   : > { %v528_v34 = vpop.xlane.xlu2 %527 }
 0x203   : > { %v529_v35 = vsub.f32 %v522_v25, %v528_v34 }
 0x205   : > { %v530_v36 = vmul.f32 1.442695, %v529_v35 }
 0x207   : > { %1172 = vpow2.f32 %v530_v36 }
 0x20d   : > { %v1173_v37 = vpop.eup %1172 }
 0x20e   : > { %v532_v38 = vsel %vm447_vm1, %v1173_v37, 0.0  ;;  %v536_v50 = vpack.c.bf16 %v1173_v37, %v1173_v37 }
 0x20f   : > { %533 = vadd.xlane.f32.xlu0 %v532_v38 }
 0x215   : > { %v469_v39 = vpop.xlane.xlu0 %468 }
 0x216   : > { %v470_v40 = vsub.f32 %v463_v28, %v469_v39 }
 0x218   : > { %v471_v41 = vmul.f32 1.442695, %v470_v40 }
 0x21a   : > { %1174 = vpow2.f32 %v471_v41 }
 0x220   : > { %v1175_v42 = vpop.eup %1174 }
 0x221   : > { %v473_v43 = vsel %vm447_vm1, %v1175_v42, 0.0  ;;  %v477_v44 = vpack.c.bf16 %v1175_v42, %v1175_v42 }
 0x222   : > { %474 = vadd.xlane.f32.xlu1 %v473_v43  ;;  %v1167_v43 = vld [vmem:[%s1587_s4] ss:$0 sm:$0xff] }
 0x223   : > { %1053 = vmatmul.msk.bf16.vlgmr.msra.gmra.mxu2 %vm447_vm1, %v477_v44 }
 0x228   : > { %v538_v45 = vpop.permute.xlu0 %537 }
 0x229   : > { %v543_v47 = vsel %vm483_vm2, %v538_v45, 0 }
 0x22a   : > { %623 = vmax.xlane.f32.xlu1 %v622_v46  ;;  %552 = vmatpush.bf16.msrb.mxu2 %v543_v47 }
 0x230   : > { %v634_v48 = vpop.permute.xlu0 %633 }
 0x231   : > { %v639_v49 = vsel %vm483_vm2, %v634_v48, 0 }
 0x232   : > { %648 = vmatpush.bf16.msra.mxu2 %v639_v49 }
 0x233   : > { %1055 = vmatmul.msk.bf16.vlgmr.msrb.gmra.mxu2 %vm447_vm1, %v536_v50  ;;  %v1310_v50 = vmov 32.0  }
 0x282   : > { %v534_v63 = vpop.xlane.xlu0 %533 }
 0x295   : > { %v475_v51 = vpop.xlane.xlu1 %474 }
 0x296   : > { %1176 = vrcp.f32 %v475_v51 }
 0x29c   : > { %v1177_v57 = vpop.eup %1176 }
 0x29d   : > { %v624_v54 = vpop.xlane.xlu1 %623 }
 0x29e   : > { %v625_v55 = vsub.f32 %v618_v30, %v624_v54 }
 0x2a0   : > { %v626_v56 = vmul.f32 1.442695, %v625_v55 }
 0x2a2   : > { %1178 = vpow2.f32 %v626_v56 }
 0x2a3   : > { %1180 = vrcp.f32 %v534_v63 }
 0x2a6   : > { %v496_v58 = vpop.f32.mrf.mxu2 }
 0x2a7   : > { %v500_v59 = vmul.f32 %v1177_v57, %v496_v58 }
 0x2a8   : > { %v1179_v60 = vpop.eup %1178 }
 0x2a9   : > { %v632_v61 = vpack.c.bf16 %v1179_v60, %v1179_v60  ;;  %v501_v62 = vpack.c.bf16 %v500_v59, %v500_v59  ;;  %v1181_v1 = vpop.eup %1180  ;;  %v628_v18 = vsel %vm447_vm1, %v1179_v60, 0.0 }
 0x2ab   : > { %1057 = vmatmul.msk.bf16.vlgmr.msrb.gmra.mxu1 %vm447_vm1, %v501_v62  ;;  %1059 = vmatmul.msk.bf16.vlgmr.msra.gmra.mxu2 %vm447_vm1, %v632_v61  ;;  %v1097_v61 = vld [vmem:[#allocation2 + $0x8] sm:$0xff]  ;;  %v1096_v62 = vld [vmem:[#allocation2] sm:$0xff] }
 0x2ae   : > { %v498_v0 = vpop.f32.mrf.mxu2 }
 0x2b6   : > { %v554_v3 = vpop.f32.mrf.mxu2 }
 0x2b7   : > { %v558_v4 = vmul.f32 %v1181_v1, %v554_v3 }
 0x2b9   : > { %v559_v5 = vpack.c.bf16 %v558_v4, %v558_v4 }
 0x2bb   : > { %1056 = vmatmul.msk.bf16.vlgmr.msrb.gmra.mxu0 %vm447_vm1, %v559_v5  ;;  %1061 = vmatmul.msk.bf16.vlgmr.msra.gmra.mxu1 %vm447_vm1, %v678_v33  ;;  %v739_v33 = vsel %vm483_vm2, %v734_v32, 0  ;;  %v1098_v32 = vld [vmem:[%s1590_s7] sm:$0xff] }
 0x2bc   : > { %748 = vmatpush.bf16.msrb.mxu2 %v739_v33  ;;  %v1170_v33 = vld [vmem:[%s1589_s6] ss:$0 sm:$0xff] }
 0x2be   : > { %v556_v6 = vpop.f32.mrf.mxu2 }
 0x328   : > { %v595_v7 = vpop.f32.mrf.mxu1 }
 0x32e   : > { %v650_v8 = vpop.f32.mrf.mxu2 }
 0x330   : > { %v597_v10 = vpop.f32.mrf.mxu1 }
 0x331   : > { %v1100_v10 = vld [vmem:[%s1590_s7 + $0x10] sm:$0xff] }
 0x336   : > { %v652_v11 = vpop.f32.mrf.mxu2 }
 0x338   : > { %v576_v12 = vpop.f32.mrf.mxu0  ;;  %v696_v13 = vpop.f32.mrf.mxu1 }
 0x339   : > { %v596_v14 = vadd.f32 %v595_v7, %v576_v12  ;;  %v700_v15 = vsel %vm447_vm1, %v696_v13, -inf  ;;  %v1101_v7 = vld [vmem:[%s1590_s7 + $0x18] sm:$0xff] }
 0x33a   : > { %701 = vmax.xlane.f32.xlu1 %v700_v15  ;;  %897 = vmatpush.bf16.msrb.mxu1 %v1101_v7 }
 0x33e   : > { %898 = vmatpush.bf16.msrb.mxu1 %v1100_v10 }
 0x340   : > { %v578_v16 = vpop.f32.mrf.mxu0  ;;  %v698_v17 = vpop.f32.mrf.mxu1 }
 0x353   : > { %711 = vrot.lane.b32.xlu1 %v1448_v9, %s1309_s25  ;;  %v656_v9 = vld [vmem:[%s1586_s3 + $0x8] sm:$0xf]  ;;  %s1244_s25 = scalar_lea.hbm %s1243_s24, 8 }
 0x354   : > { %v661_v27 = vsel %vm483_vm2, %v656_v9, 0  ;;  %v1529_v9 = vld [vmem:[%s1593_s10] ss:$0 sm:$0xff]  ;;  %p1245_p0 = scmp.ne.s32.totalorder %s1243_s24, %s1244_s25  ;;  %p1250_p4 = scmp.lt.s32.totalorder %s1248_s30, %s1244_s25 }
 0x355   : > { %670 = vmatpush.bf16.msra.mxu0 %v661_v27 }
 0x356   : > { %p1246_p1 = pnand %p1245_p0, %p1409_p5  ;;  %p1251_p7 = por %p1250_p4, %p1249_p3 }
 0x358   : > { %p1247_p2 = pneg %p1246_p1 }
 0x359   : > { %844 = vmatpush.bf16.msrb.mxu0 %v1097_v61 }
 0x35a   : > { %p1252_p8 = pnand %p1251_p7, %p1247_p2 }
 0x35d   : > { %845 = vmatpush.bf16.msrb.mxu0 %v1096_v62 }
 0x37d   : > { %629 = vadd.xlane.f32.xlu1 %v628_v18 }
 0x3ad   : > { %v702_v19 = vpop.xlane.xlu1 %701 }
 0x3ae   : > { %v703_v20 = vsub.f32 %v696_v13, %v702_v19 }
 0x3b0   : > { %v704_v21 = vmul.f32 1.442695, %v703_v20  ;;  %v1523_v20 = vld [vmem:[%s1592_s9] ss:$0 sm:$0xff] }
 0x3b2   : > { %1182 = vpow2.f32 %v704_v21 }
 0x3b8   : > { %v1183_v22 = vpop.eup %1182 }
 0x3b9   : > { %v706_v23 = vsel %vm447_vm1, %v1183_v22, 0.0  ;;  %v710_v26 = vpack.c.bf16 %v1183_v22, %v1183_v22 }
 0x3ba   : > { %707 = vadd.xlane.f32.xlu2 %v706_v23 }
 0x3c5   : > { %v712_v24 = vpop.permute.xlu1 %711 }
 0x3c6   : > { %v717_v25 = vsel %vm483_vm2, %v712_v24, 0 }
 0x3c7   : > { %726 = vmatpush.bf16.msra.mxu3 %v717_v25 }
 0x3ca   : > { %1062 = vmatmul.msk.bf16.vlgmr.msra.gmra.mxu3 %vm447_vm1, %v710_v26 }
 0x3f0   : > { %v630_v28 = vpop.xlane.xlu1 %629 }
 0x3f1   : > { %1184 = vrcp.f32 %v630_v28 }
 0x3f7   : > { %v1185_v29 = vpop.eup %1184 }
 0x3f8   : > { %v654_v30 = vmul.f32 %v1185_v29, %v650_v8 }
 0x3fa   : > { %v655_v31 = vpack.c.bf16 %v654_v30, %v654_v30 }
 0x3fc   : > { %1060 = vmatmul.msk.bf16.vlgmr.msra.gmra.mxu0 %vm447_vm1, %v655_v31  ;;  %v1099_v31 = vld [vmem:[%s1590_s7 + $0x8] sm:$0xff] }
 0x3fd   : > { %899 = vmatpush.bf16.msrb.mxu1 %v1099_v31 }
 0x401   : > { %900 = vmatpush.bf16.msrb.mxu1 %v1098_v32 }
 0x42d   : > { %v708_v34 = vpop.xlane.xlu2 %707 }
 0x42e   : > { %1186 = vrcp.f32 %v708_v34 }
 0x42f   : > { %1188 = vrcp.f32 %v1310_v50 }
 0x434   : > { %v1187_v35 = vpop.eup %1186 }
 0x435   : > { %v1189_v51 = vpop.eup %1188 }
 0x436   : > { %v765_v52 = vmul.f32 32.0, %v1189_v51  ;;  %vm769_vm3 = vweird.f32 %v1189_v51 }
 0x438   : > { %v766_v53 = vsub.f32 1.0, %v765_v52 }
 0x43a   : > { %v767_v54 = vmul.f32 %v1189_v51, %v766_v53 }
 0x43c   : > { %v768_v55 = vadd.f32 %v1189_v51, %v767_v54 }
 0x43e   : > { %v1510_v56 = vsel %vm769_vm3, %v1189_v51, %v768_v55 }
 0x44d   : > { %v728_v36 = vpop.f32.mrf.mxu3 }
 0x44e   : > { %v732_v37 = vmul.f32 %v1187_v35, %v728_v36 }
 0x450   : > { %v733_v38 = vpack.c.bf16 %v732_v37, %v732_v37 }
 0x452   : > { %1063 = vmatmul.msk.bf16.vlgmr.msrb.gmra.mxu2 %vm447_vm1, %v733_v38 }
 0x455   : > { %v730_v39 = vpop.f32.mrf.mxu3 }
 0x456   : > { %v1171_v39 = vld [vmem:[%s1591_s8] ss:$0 sm:$0xff] }
 0x479   : > { %v672_v40 = vpop.f32.mrf.mxu0 }
 0x47a   : > { %v676_v41 = vadd.f32 %v672_v40, %v596_v14 }
 0x481   : > { %v674_v42 = vpop.f32.mrf.mxu0 }
 0x4d5   : > { %v750_v44 = vpop.f32.mrf.mxu2 }
 0x4d6   : > { %v754_v45 = vadd.f32 %v750_v44, %v676_v41 }
 0x4d8   : > { %v759_v46 = vadd.f32 %v1167_v43, %v754_v45 }
 0x4da   : > { %v760_v47 = vadd.f32 %v759_v46, %v1440_v2 }
 0x4dc   : > { %v761_v48 = vsel %vm424_vm0, %v760_v47, 0.0 }
 0x4dd   : > { %v752_v49 = vpop.f32.mrf.mxu2  ;;  %762 = vadd.xlane.f32.xlu2 %v761_v48 }
 0x550   : > { %v763_v57 = vpop.xlane.xlu2 %762 }
 0x551   : > { %v771_v58 = vmul.f32 %v1510_v56, %v763_v57 }
 0x553   : > { %v772_v59 = vsub.f32 %v760_v47, %v771_v58 }
 0x555   : > { %v773_v60 = vmul.f32 %v772_v59, %v772_v59  ;;  %v793_v25 = vmul.f32 %v1523_v20, %v772_v59 }
 0x557   : > { %v774_v2 = vsel %vm424_vm0, %v773_v60, 0.0 }
 0x558   : > { %775 = vadd.xlane.f32.xlu2 %v774_v2 }
 0x5cb   : > { %v776_v63 = vpop.xlane.xlu2 %775 }
 0x5cc   : > { %v777_v0 = vmul.f32 0.032258064, %v776_v63 }
 0x5ce   : > { %1190 = vrsqrt.f32 %v777_v0  ;;  %vm785_vm4 = vcmp.eq.f32.partialorder %v777_v0, inf  ;;  %v788_v12 = vand.u32 2147483648, %v777_v0  ;;  %vm787_vm5 = vcmp.eq.f32.partialorder %v777_v0, 0.0 }
 0x5d4   : > { %v1191_v1 = vpop.eup %1190 }
 0x5d5   : > { %v779_v3 = vmul.f32 %v1191_v1, %v777_v0 }
 0x5d7   : > { %v780_v4 = vmul.f32 %v1191_v1, %v779_v3 }
 0x5d9   : > { %v781_v5 = vmul.f32 0.5, %v780_v4 }
 0x5db   : > { %v782_v6 = vsub.f32 1.5, %v781_v5 }
 0x5dd   : > { %v783_v8 = vmul.f32 %v1191_v1, %v782_v6 }
 0x5df   : > { %v784_v11 = vmul.f32 %v783_v8, %v777_v0 }
 0x5e1   : > { %v786_v13 = vsel %vm785_vm4, %v777_v0, %v784_v11 }
 0x5e2   : > { %v789_v14 = vsel %vm787_vm5, %v788_v12, %v786_v13 }
 0x5e3   : > { %v794_v15 = vadd.f32 1e-06, %v789_v14 }
 0x5e5   : > { %1192 = vrcp.f32 %v794_v15  ;;  %v806_v19 = vand.u32 2147483648, %v794_v15  ;;  %v804_v22 = vand.u32 2147483647, %v794_v15  ;;  %vm800_vm7 = vweird.f32 %v794_v15 }
 0x5e7   : > { %v807_v24 = vor.u32 1.1754944e-38, %v806_v19  ;;  %vm805_vm9 = vcmp.eq.f32.partialorder %v804_v22, 8.507059e+37 }
 0x5eb   : > { %v1193_v16 = vpop.eup %1192 }
 0x5ec   : > { %v796_v17 = vmul.f32 %v1193_v16, %v794_v15  ;;  %vm801_vm6 = vweird.f32 %v1193_v16 }
 0x5ed   : > { %vm802_vm8 = vmor %vm800_vm7, %vm801_vm6 }
 0x5ee   : > { %v797_v18 = vsub.f32 1.0, %v796_v17 }
 0x5f0   : > { %v798_v21 = vmul.f32 %v1193_v16, %v797_v18 }
 0x5f2   : > { %v799_v23 = vadd.f32 %v1193_v16, %v798_v21 }
 0x5f4   : > { %v803_v26 = vsel %vm802_vm8, %v1193_v16, %v799_v23 }
 0x5f5   : > { %v808_v27 = vsel %vm805_vm9, %v807_v24, %v803_v26 }
 0x5f6   : > { %v809_v28 = vmul.f32 %v808_v27, %v793_v25 }
 0x5f8   : > { %v813_v29 = vadd.f32 %v1529_v9, %v809_v28 }
 0x5fa   : > { %v814_v30 = vpack.c.bf16 %v813_v29, %v813_v29 }
 0x5fc   : > { %1072 = vmatmul.msk.bf16.vlgmr.msrb.gmra.mxu0 %vm424_vm0, %v814_v30 }
 0x679   : > { %v847_v34 = vpop.f32.mrf.mxu0 }
 0x67a   : > { %v848_v35 = vadd.f32 %v1170_v33, %v847_v34 }
 0x67c   : > { %v851_v36 = vmax.f32 %v848_v35, 0.0 }
 0x67e   : > { %v852_v37 = vpack.c.bf16 %v851_v36, %v851_v36 }
 0x680   : > { %1089 = vmatmul.msk.bf16.vlgmr.msrb.gmra.mxu1 %vm889_vm10, %v852_v37 }
 0x681   : > { %v849_v38 = vpop.f32.mrf.mxu0 }
 0x6fd   : > { %v902_v40 = vpop.f32.mrf.mxu1 }
 0x6fe   : > { %v903_v41 = vadd.f32 %v1171_v39, %v902_v40 }
 0x700   : > { %v906_v42 = vadd.f32 %v903_v41, %v813_v29 }
 0x702   : > { %v907_v43 = vsel %vm424_vm0, %v906_v42, 0.0 }
 0x703   : > { %908 = vadd.xlane.f32.xlu2 %v907_v43 }
 0x705   : > { %v904_v44 = vpop.f32.mrf.mxu1 }
 0x776   : > { %v909_v45 = vpop.xlane.xlu2 %908 }
 0x777   : > { %v910_v46 = vmul.f32 %v909_v45, %v1510_v56 }
 0x779   : > { %v911_v47 = vsub.f32 %v906_v42, %v910_v46 }
 0x77b   : > { %v912_v48 = vmul.f32 %v911_v47, %v911_v47  ;;  %v929_v7 = vmul.f32 %v1523_v20, %v911_v47 }
 0x77d   : > { %v913_v49 = vsel %vm424_vm0, %v912_v48, 0.0 }
 0x77e   : > { %914 = vadd.xlane.f32.xlu0 %v913_v49 }
 0x7f1   : > { %v915_v50 = vpop.xlane.xlu0 %914 }
 0x7f2   : > { %v916_v51 = vmul.f32 0.032258064, %v915_v50 }
 0x7f4   : > { %1194 = vrsqrt.f32 %v916_v51  ;;  %vm924_vm11 = vcmp.eq.f32.partialorder %v916_v51, inf  ;;  %v927_v60 = vand.u32 2147483648, %v916_v51  ;;  %vm926_vm12 = vcmp.eq.f32.partialorder %v916_v51, 0.0 }
 0x7fa   : > { %v1195_v52 = vpop.eup %1194 }
 0x7fb   : > { %v918_v53 = vmul.f32 %v1195_v52, %v916_v51 }
 0x7fd   : > { %v919_v54 = vmul.f32 %v1195_v52, %v918_v53 }
 0x7ff   : > { %v920_v55 = vmul.f32 0.5, %v919_v54 }
 0x801   : > { %v921_v57 = vsub.f32 1.5, %v920_v55 }
 0x803   : > { %v922_v58 = vmul.f32 %v1195_v52, %v921_v57 }
 0x805   : > { %v923_v59 = vmul.f32 %v922_v58, %v916_v51 }
 0x807   : > { %v925_v56 = vsel %vm924_vm11, %v916_v51, %v923_v59 }
 0x808   : > { %v928_v2 = vsel %vm926_vm12, %v927_v60, %v925_v56 }
 0x809   : > { %v930_v61 = vadd.f32 1e-06, %v928_v2 }
 0x80b   : > { %1196 = vrcp.f32 %v930_v61  ;;  %v942_v1 = vand.u32 2147483648, %v930_v61  ;;  %v940_v4 = vand.u32 2147483647, %v930_v61  ;;  %vm936_vm14 = vweird.f32 %v930_v61 }
 0x80d   : > { %v943_v6 = vor.u32 1.1754944e-38, %v942_v1  ;;  %vm941_vm1 = vcmp.eq.f32.partialorder %v940_v4, 8.507059e+37 }
 0x811   : > { %v1197_v62 = vpop.eup %1196 }
 0x812   : > { %v932_v63 = vmul.f32 %v1197_v62, %v930_v61  ;;  %vm937_vm13 = vweird.f32 %v1197_v62 }
 0x813   : > { %vm938_vm15 = vmor %vm936_vm14, %vm937_vm13 }
 0x814   : > { %v933_v0 = vsub.f32 1.0, %v932_v63 }
 0x816   : > { %v934_v3 = vmul.f32 %v1197_v62, %v933_v0 }
 0x818   : > { %v935_v5 = vadd.f32 %v1197_v62, %v934_v3 }
 0x81a   : > { %v939_v8 = vsel %vm938_vm15, %v1197_v62, %v935_v5 }
 0x81b   : > { %v944_v10 = vsel %vm941_vm1, %v943_v6, %v939_v8 }
 0x81c   : > { %v945_v11 = vmul.f32 %v944_v10, %v929_v7 }
 0x81e   : > { %v946_v12 = vadd.f32 %v1529_v9, %v945_v11 }
 0x820   : > { %947 = vst.msk [vmem:[%s394_s16] sm:$0xff] %vm424_vm0, %v946_v12 }
 0x821   : > { %1255 = shalt.err (!%p1252_p8)
}
 0x822   : > { %1106 = dma.vmem_to_hbm [thread:$0]  (%p1409_p5), %s962_s5, 128, %s964_s21, %s949_s22  }
 0x823 PF: > { %p1118_p9 = scmp.ge.s32.totalorder %s1294_s20, 2  ;;  %s975_s29 = sand.u32 1, %s1282_s17  }
 0x824   : > { %s976_s16 = scalar_lea.sflag [#allocation4], %s975_s29 }
 0x825   : > { %p1113_p10 = pnand %p1118_p9, %p1413_p6 }
 0x827   : > { %p1114_p11 = pneg %p1113_p10 }
 0x829   : > { %1277 = dma.done.wait (%p1114_p11), %s976_s16, 128  }
 0x82a   : > { %1279 = vsyncadd (%p1114_p11), %s976_s16, 4294967168  ;;  %p22_p12 = scmp.ge.s32.totalorder %s1396_s23, 4   ;;  %s1599_s17 = smov %s1286_s18 }
 0x82b   : > { %s1600_s18 = smov %s1290_s19  ;;  %s1601_s19 = smov %s1407_s26 }
 0x82c   : > { %s1602_s20 = smov %s1396_s23  ;;  %24 = sbr.rel (!%p22_p12) target bundleno = 6 (0x6), region = 104 }
 0x831   :  { %982 = vsyncpa [#allocation3], 1 }
 0x832   :  { %984 = vsyncpa [#allocation3 + $0x1], 1 }
 0x833   :  { %985 = vsyncpa [#allocation4], 1 }
 0x834   :  { %987 = vsyncpa [#allocation4 + $0x1], 1 }

</bundles_post_ra>
